<compile_context>
chip_gen: v5e
topology: v5e:2x2
jax: 0.10.0
libtpu: 0.0.40
codegen_flags: <defaults>
</compile_context>

<pallas_src>
import jax
import jax.numpy as jnp
from jax.experimental import pallas as pl
from jax.experimental.pallas import tpu as pltpu

NUM_ENSEMBLE = 5
IN_DIM = 1
H1, H2, H3 = 64, 32, 16
OUT_DIM = 1

# Packed (lane-axis) layer widths.
W1_ALL = NUM_ENSEMBLE * H1          # 320
W2_ALL = NUM_ENSEMBLE * H2          # 160
W3_ALL = NUM_ENSEMBLE * 2 * H3      # 160  ([mean|logvar] per member)
WH_ALL = 2 * NUM_ENSEMBLE           # 10   (cols 0..4 mean, 5..9 logvar)


def _ensemble_kernel(x_ref, l1_ref, l2_ref, l3_ref, lh_ref, mean_ref, stats_ref):
    """Single invocation, all 5 ensemble members packed along the lane axis.

    Shapes (B = batch):
      x_ref:     (B, 1)
      l1_ref:    (2, 320)    row 0 = w1_all, row 1 = b1_all
      l2_ref:    (321, 160)  rows 0..319 = block-diag w2_all, row 320 = b2_all
      l3_ref:    (161, 160)  rows 0..159 = block-diag w3_all, row 160 = b3_all
      lh_ref:    (161, 10)   rows 0..159 = wh_all,           row 160 = bh_all
      mean_ref:  (B, 5)      column e = member e's predicted mean
      stats_ref: (1, 2)      [ensemble_mean, ensemble_variance]
    """
    batch = x_ref.shape[0]
    x = x_ref[...]                                                       # (B, 1)

    # fc1 (1 -> 64 per member): K == 1 -> one broadcast multiply for all members.
    h = jnp.maximum(x * l1_ref[0:1, :] + l1_ref[1:2, :], 0.0)            # (B, 320)

    # fc2 (64 -> 32 per member), block-diagonal: single MXU matmul.
    h = jnp.maximum(
        jnp.dot(h, l2_ref[0:W1_ALL, :], preferred_element_type=jnp.float32)
        + l2_ref[W1_ALL:W1_ALL + 1, :], 0.0)                             # (B, 160)

    # fc3_mean | fc3_logvar (32 -> 16+16 per member), block-diagonal.
    h = jnp.maximum(
        jnp.dot(h, l3_ref[0:W2_ALL, :], preferred_element_type=jnp.float32)
        + l3_ref[W2_ALL:W2_ALL + 1, :], 0.0)                             # (B, 160)

    # heads (16 -> 1 per member, mean + logvar): natural orientation, no transpose.
    heads = (jnp.dot(h, lh_ref[0:W3_ALL, :], preferred_element_type=jnp.float32)
             + lh_ref[W3_ALL:W3_ALL + 1, :])                             # (B, 10)

    mean_blk = heads[:, 0:NUM_ENSEMBLE]                                  # (B, 5)
    logvar_blk = heads[:, NUM_ENSEMBLE:2 * NUM_ENSEMBLE]                 # (B, 5)
    var_blk = jnp.exp(logvar_blk) + mean_blk * mean_blk                  # one batched exp

    mean_ref[...] = mean_blk

    inv_n = 1.0 / float(NUM_ENSEMBLE * batch)
    em = jnp.sum(jnp.sum(mean_blk, axis=1, keepdims=True),
                 axis=0, keepdims=True) * inv_n                          # (1, 1)
    ev = jnp.sum(jnp.sum(var_blk, axis=1, keepdims=True),
                 axis=0, keepdims=True) * inv_n - em * em                # (1, 1)
    stats_ref[...] = jnp.concatenate([em, ev], axis=1)                   # (1, 2)


def ensemble_prob_nn_forward(x, packed):
    """x: (B, 1) f32. packed: dict of block-diagonal lane-packed parameters.

    Returns (ensemble_mean (1,1), ensemble_variance (1,1),
             ensemble_mean_samples (5*B, 1)) matching the PyTorch module."""
    B, _ = x.shape
    flops = int(2 * B * (W1_ALL + W1_ALL * W2_ALL + W2_ALL * W3_ALL
                         + W3_ALL * WH_ALL))
    bytes_accessed = int(4 * (B * IN_DIM + 2 * W1_ALL + (W1_ALL + 1) * W2_ALL
                              + (W2_ALL + 1) * W3_ALL + (W3_ALL + 1) * WH_ALL
                              + B * NUM_ENSEMBLE + 2))

    vmem = pl.BlockSpec(memory_space=pltpu.MemorySpace.VMEM)
    mean_blk, stats = pl.pallas_call(
        _ensemble_kernel,
        out_shape=(
            jax.ShapeDtypeStruct((B, NUM_ENSEMBLE), jnp.float32),  # per-member means
            jax.ShapeDtypeStruct((1, 2), jnp.float32),             # [mean, variance]
        ),
        in_specs=[vmem, vmem, vmem, vmem, vmem],
        out_specs=(vmem, vmem),
        cost_estimate=pl.CostEstimate(
            flops=flops, transcendentals=NUM_ENSEMBLE * B,
            bytes_accessed=bytes_accessed),
    )(x, packed["l1"], packed["l2"], packed["l3"], packed["lh"])

    # torch.cat((mean0,...,mean4), dim=0): member-major -> transpose then reshape
    # (cheap XLA layout plumbing outside the kernel).
    samples = mean_blk.T.reshape(NUM_ENSEMBLE * B, OUT_DIM)
    emean = stats[:, 0:1]
    evar = stats[:, 1:2]
    return emean, evar, samples


def init_params(key):
    """Deterministic PyTorch-style uniform(-1/sqrt(fan_in), 1/sqrt(fan_in)) init."""
    def linear(k, fan_in, fan_out):
        kw, kb = jax.random.split(k)
        bound = 1.0 / (fan_in ** 0.5)
        w = jax.random.uniform(kw, (fan_in, fan_out), jnp.float32, -bound, bound)
        b = jax.random.uniform(kb, (1, fan_out), jnp.float32, -bound, bound)
        return w, b

    members = []
    for mk in jax.random.split(key, NUM_ENSEMBLE):
        k1, k2, k3m, k3v, km, kv = jax.random.split(mk, 6)
        w1, b1 = linear(k1, IN_DIM, H1)
        w2, b2 = linear(k2, H1, H2)
        w3m, b3m = linear(k3m, H2, H3)
        w3v, b3v = linear(k3v, H2, H3)
        wm, bm = linear(km, H3, OUT_DIM)
        wv, bv = linear(kv, H3, OUT_DIM)
        members.append(dict(w1=w1, b1=b1, w2=w2, b2=b2, w3m=w3m, b3m=b3m,
                            w3v=w3v, b3v=b3v, wm=wm, bm=bm, wv=wv, bv=bv))
    return members


def _block_diag(blocks):
    rows = sum(b.shape[0] for b in blocks)
    cols = sum(b.shape[1] for b in blocks)
    out = jnp.zeros((rows, cols), jnp.float32)
    r = c = 0
    for b in blocks:
        out = out.at[r:r + b.shape[0], c:c + b.shape[1]].set(b)
        r += b.shape[0]
        c += b.shape[1]
    return out


def pack_params(members):
    """Pack the 5 members into block-diagonal lane-packed layers (host-side)."""
    # fc1: lane-concat all members; bias appended as second sublane row.
    w1_all = jnp.concatenate([m["w1"] for m in members], axis=1)          # (1, 320)
    b1_all = jnp.concatenate([m["b1"] for m in members], axis=1)          # (1, 320)
    l1 = jnp.concatenate([w1_all, b1_all], axis=0)                        # (2, 320)

    # fc2: block-diag weights + appended bias row.
    w2_all = _block_diag([m["w2"] for m in members])                      # (320, 160)
    b2_all = jnp.concatenate([m["b2"] for m in members], axis=1)          # (1, 160)
    l2 = jnp.concatenate([w2_all, b2_all], axis=0)                        # (321, 160)

    # fc3: per-member (32, 32) block = [fc3_mean | fc3_logvar], block-diag.
    w3_all = _block_diag([jnp.concatenate([m["w3m"], m["w3v"]], axis=1)
                          for m in members])                              # (160, 160)
    b3_all = jnp.concatenate([jnp.concatenate([m["b3m"], m["b3v"]], axis=1)
                              for m in members], axis=1)                  # (1, 160)
    l3 = jnp.concatenate([w3_all, b3_all], axis=0)                        # (161, 160)

    # heads: cols 0..4 = mean heads, cols 5..9 = logvar heads.
    wh_all = jnp.zeros((W3_ALL, WH_ALL), jnp.float32)
    for e, m in enumerate(members):
        base = e * 2 * H3
        wh_all = wh_all.at[base:base + H3, e].set(m["wm"][:, 0])
        wh_all = wh_all.at[base + H3:base + 2 * H3,
                           NUM_ENSEMBLE + e].set(m["wv"][:, 0])
    bh_all = jnp.concatenate([m["bm"] for m in members]
                             + [m["bv"] for m in members], axis=1)        # (1, 10)
    lh = jnp.concatenate([wh_all, bh_all], axis=0)                        # (161, 10)

    return {"l1": l1, "l2": l2, "l3": l3, "lh": lh}


def reference_forward(x, members):
    """Pure-JAX replica of the PyTorch forward, for correctness checking."""
    relu = jax.nn.relu
    means, logvars = [], []
    for p in members:
        h = relu(x @ p["w1"] + p["b1"])
        h = relu(h @ p["w2"] + p["b2"])
        hm = relu(h @ p["w3m"] + p["b3m"])
        hv = relu(h @ p["w3v"] + p["b3v"])
        means.append(hm @ p["wm"] + p["bm"])
        logvars.append(hv @ p["wv"] + p["bv"])
    samples = jnp.concatenate(means, axis=0)                       # (5B, 1)
    emean = jnp.mean(samples, axis=0, keepdims=True)               # (1, 1)
    evar = jnp.mean(
        jnp.concatenate([jnp.exp(lv) + m * m for m, lv in zip(means, logvars)], axis=0),
        axis=0, keepdims=True) - emean * emean                     # (1, 1)
    return emean, evar, samples


if __name__ == "__main__":
    key = jax.random.PRNGKey(0)
    k_params, k_x = jax.random.split(key)

    B = 8
    x = jax.random.normal(k_x, (B, IN_DIM), dtype=jnp.float32)

    members = init_params(k_params)
    packed = pack_params(members)

    emean, evar, samples = jax.block_until_ready(
        jax.jit(ensemble_prob_nn_forward)(x, packed))

    emean_ref, evar_ref, samples_ref = reference_forward(x, members)

    assert emean.shape == (1, OUT_DIM)
    assert evar.shape == (1, OUT_DIM)
    assert samples.shape == (NUM_ENSEMBLE * B, OUT_DIM)
    assert jnp.allclose(samples, samples_ref, atol=1e-5, rtol=1e-5)
    assert jnp.allclose(emean, emean_ref, atol=1e-5, rtol=1e-5)
    assert jnp.allclose(evar, evar_ref, atol=1e-5, rtol=1e-5)

    print("KERNEL_OK")
</pallas_src>

<mosaic_0001>
module attributes {stable_mosaic.version = 11 : i64} {
  func.func @_ensemble_kernel(%arg0: memref<8x1xf32, #tpu.memory_space<vmem>>, %arg1: memref<2x320xf32, #tpu.memory_space<vmem>>, %arg2: memref<321x160xf32, #tpu.memory_space<vmem>>, %arg3: memref<161x160xf32, #tpu.memory_space<vmem>>, %arg4: memref<161x10xf32, #tpu.memory_space<vmem>>, %arg5: memref<8x5xf32, #tpu.memory_space<vmem>>, %arg6: memref<1x2xf32, #tpu.memory_space<vmem>>) attributes {dimension_semantics = [], scalar_prefetch = 0 : i64, scratch_operands = 0 : i64, tpu.core_type = #tpu.core_type<tc>} {
    %c0 = arith.constant 0 : index
    %c0_0 = arith.constant 0 : index
    %0 = vector.load %arg0[%c0, %c0_0] : memref<8x1xf32, #tpu.memory_space<vmem>>, vector<8x1xf32>
    %c0_1 = arith.constant 0 : index
    %c0_2 = arith.constant 0 : index
    %1 = vector.load %arg1[%c0_1, %c0_2] : memref<2x320xf32, #tpu.memory_space<vmem>>, vector<1x320xf32>
    %2 = vector.broadcast %0 : vector<8x1xf32> to vector<8x320xf32>
    %3 = vector.broadcast %1 : vector<1x320xf32> to vector<8x320xf32>
    %4 = arith.mulf %2, %3 : vector<8x320xf32>
    %c1 = arith.constant 1 : index
    %c0_3 = arith.constant 0 : index
    %5 = vector.load %arg1[%c1, %c0_3] : memref<2x320xf32, #tpu.memory_space<vmem>>, vector<1x320xf32>
    %6 = vector.broadcast %5 : vector<1x320xf32> to vector<8x320xf32>
    %7 = arith.addf %4, %6 : vector<8x320xf32>
    %cst = arith.constant 0.000000e+00 : f32
    %8 = vector.broadcast %cst : f32 to vector<8x320xf32>
    %9 = arith.maximumf %7, %8 : vector<8x320xf32>
    %c0_4 = arith.constant 0 : index
    %c0_5 = arith.constant 0 : index
    %10 = vector.load %arg2[%c0_4, %c0_5] : memref<321x160xf32, #tpu.memory_space<vmem>>, vector<320x160xf32>
    %cst_6 = arith.constant dense<0.000000e+00> : vector<8x160xf32>
    %11 = tpu.matmul %9, %10, %cst_6 {dimension_numbers = #tpu.dot_dimension_numbers<[1], [0], [0], [1], [0, 0, 1, 1], [], []>} : vector<8x320xf32>, vector<320x160xf32>, vector<8x160xf32> -> vector<8x160xf32>
    %c320 = arith.constant 320 : index
    %c0_7 = arith.constant 0 : index
    %12 = vector.load %arg2[%c320, %c0_7] : memref<321x160xf32, #tpu.memory_space<vmem>>, vector<1x160xf32>
    %13 = vector.broadcast %12 : vector<1x160xf32> to vector<8x160xf32>
    %14 = arith.addf %11, %13 : vector<8x160xf32>
    %cst_8 = arith.constant 0.000000e+00 : f32
    %15 = vector.broadcast %cst_8 : f32 to vector<8x160xf32>
    %16 = arith.maximumf %14, %15 : vector<8x160xf32>
    %c0_9 = arith.constant 0 : index
    %c0_10 = arith.constant 0 : index
    %17 = vector.load %arg3[%c0_9, %c0_10] : memref<161x160xf32, #tpu.memory_space<vmem>>, vector<160x160xf32>
    %cst_11 = arith.constant dense<0.000000e+00> : vector<8x160xf32>
    %18 = tpu.matmul %16, %17, %cst_11 {dimension_numbers = #tpu.dot_dimension_numbers<[1], [0], [0], [1], [0, 0, 1, 1], [], []>} : vector<8x160xf32>, vector<160x160xf32>, vector<8x160xf32> -> vector<8x160xf32>
    %c160 = arith.constant 160 : index
    %c0_12 = arith.constant 0 : index
    %19 = vector.load %arg3[%c160, %c0_12] : memref<161x160xf32, #tpu.memory_space<vmem>>, vector<1x160xf32>
    %20 = vector.broadcast %19 : vector<1x160xf32> to vector<8x160xf32>
    %21 = arith.addf %18, %20 : vector<8x160xf32>
    %cst_13 = arith.constant 0.000000e+00 : f32
    %22 = vector.broadcast %cst_13 : f32 to vector<8x160xf32>
    %23 = arith.maximumf %21, %22 : vector<8x160xf32>
    %c0_14 = arith.constant 0 : index
    %c0_15 = arith.constant 0 : index
    %24 = vector.load %arg4[%c0_14, %c0_15] : memref<161x10xf32, #tpu.memory_space<vmem>>, vector<160x10xf32>
    %cst_16 = arith.constant dense<0.000000e+00> : vector<8x10xf32>
    %25 = tpu.matmul %23, %24, %cst_16 {dimension_numbers = #tpu.dot_dimension_numbers<[1], [0], [0], [1], [0, 0, 1, 1], [], []>} : vector<8x160xf32>, vector<160x10xf32>, vector<8x10xf32> -> vector<8x10xf32>
    %c160_17 = arith.constant 160 : index
    %c0_18 = arith.constant 0 : index
    %26 = vector.load %arg4[%c160_17, %c0_18] : memref<161x10xf32, #tpu.memory_space<vmem>>, vector<1x10xf32>
    %27 = vector.broadcast %26 : vector<1x10xf32> to vector<8x10xf32>
    %28 = arith.addf %25, %27 : vector<8x10xf32>
    %29 = vector.extract_strided_slice %28 {offsets = [0, 0], sizes = [8, 5], strides = [1, 1]} : vector<8x10xf32> to vector<8x5xf32>
    %30 = vector.extract_strided_slice %28 {offsets = [0, 5], sizes = [8, 5], strides = [1, 1]} : vector<8x10xf32> to vector<8x5xf32>
    %31 = math.exp %30 : vector<8x5xf32>
    %32 = arith.mulf %29, %29 : vector<8x5xf32>
    %33 = arith.addf %31, %32 : vector<8x5xf32>
    %c0_19 = arith.constant 0 : index
    %c0_20 = arith.constant 0 : index
    %34 = vector.load %arg5[%c0_19, %c0_20] : memref<8x5xf32, #tpu.memory_space<vmem>>, vector<8x5xf32>
    tpu.vector_store %arg5[%c0_19, %c0_20], %29 {strides = array<i32>} : memref<8x5xf32, #tpu.memory_space<vmem>>, vector<8x5xf32>,
    %cst_21 = arith.constant dense<0.000000e+00> : vector<8xf32>
    %35 = vector.multi_reduction <add>, %29, %cst_21 [1] : vector<8x5xf32> to vector<8xf32>
    %36 = vector.shape_cast %35 : vector<8xf32> to vector<8x1xf32>
    %cst_22 = arith.constant dense<0.000000e+00> : vector<1xf32>
    %37 = vector.multi_reduction <add>, %36, %cst_22 [0] : vector<8x1xf32> to vector<1xf32>
    %38 = vector.shape_cast %37 : vector<1xf32> to vector<1x1xf32>
    %cst_23 = arith.constant 2.500000e-02 : f32
    %39 = vector.broadcast %cst_23 : f32 to vector<1x1xf32>
    %40 = arith.mulf %38, %39 : vector<1x1xf32>
    %cst_24 = arith.constant dense<0.000000e+00> : vector<8xf32>
    %41 = vector.multi_reduction <add>, %33, %cst_24 [1] : vector<8x5xf32> to vector<8xf32>
    %42 = vector.shape_cast %41 : vector<8xf32> to vector<8x1xf32>
    %cst_25 = arith.constant dense<0.000000e+00> : vector<1xf32>
    %43 = vector.multi_reduction <add>, %42, %cst_25 [0] : vector<8x1xf32> to vector<1xf32>
    %44 = vector.shape_cast %43 : vector<1xf32> to vector<1x1xf32>
    %cst_26 = arith.constant 2.500000e-02 : f32
    %45 = vector.broadcast %cst_26 : f32 to vector<1x1xf32>
    %46 = arith.mulf %44, %45 : vector<1x1xf32>
    %47 = arith.mulf %40, %40 : vector<1x1xf32>
    %48 = arith.subf %46, %47 : vector<1x1xf32>
    %49 = tpu.concatenate %40, %48 in 1 : vector<1x1xf32>, vector<1x1xf32> -> vector<1x2xf32>
    %c0_27 = arith.constant 0 : index
    %c0_28 = arith.constant 0 : index
    %50 = vector.load %arg6[%c0_27, %c0_28] : memref<1x2xf32, #tpu.memory_space<vmem>>, vector<1x2xf32>
    tpu.vector_store %arg6[%c0_27, %c0_28], %49 {strides = array<i32>} : memref<1x2xf32, #tpu.memory_space<vmem>>, vector<1x2xf32>,
    return
  }
}

</mosaic_0001>

<bundles_post_ra>
// kernel: ensemble_prob_nn_forward.1
= control target key start
LH: loop header
LB: loop body
LE: loop exit
PB: predicated region body
PF: predicated region fallthrough
CT: control target
= control target key end

     0   :  { %v528_v0 = vmov 0   ;;  %vm141_vm0 = vcmask 523264   ;;  %vm314_vm1 = vcmask 261120   ;;  %vm473_vm2 = vcmask 39936   ;;  %s529_s8 = smov 5   ;;  %s530_s9 = smov 123   ;;  %s1016_s0 = inlined_call_operand.vmem [shape: f32[8,1], index: 0, kind: input, shape index: {}]   ;;  %s1017_s2 = inlined_call_operand.vmem [shape: f32[321,160], index: 2, kind: input, shape index: {}]   ;;  %s1018_s3 = inlined_call_operand.vmem [shape: f32[161,160], index: 3, kind: input, shape index: {}]   ;;  %s1019_s1 = inlined_call_operand.vmem [shape: f32[2,320], index: 1, kind: input, shape index: {}]   ;;  %s1020_s4 = inlined_call_operand.vmem [shape: f32[161,10], index: 4, kind: input, shape index: {}]   ;;  %s1021_s5 = inlined_call_operand.vmem [shape: f32[8,5], index: 5, kind: output, shape index: {0}]   ;;  %s1022_s6 = inlined_call_operand.vmem [shape: f32[1,2], index: 6, kind: output, shape index: {1}]  }
   0x1   :  { %524 = vset.pattern.permute.xlu0 %v528_v0  ;;  %v22_v1 = vld [vmem:[%s1016_s0] sm:$0xff]  ;;  %v84_v2 = vld [vmem:[%s1017_s2 + $0xf0] sm:$0xff]  ;;  %v85_v9 = vld [vmem:[%s1017_s2 + $0xf8] sm:$0xff]  ;;  %vm501_vm3 = vcmask 7168   ;;  %vm503_vm4 = vcmask 8192  }
   0x2   :  { %v132_v3 = vld [vmem:[%s1017_s2 + $0x270] sm:$0xff]  ;;  %26 = vperm.xlu0 %524, %v22_v1   ;;  %145 = vmatpush.msra.mxu0 %v84_v2  ;;  %v82_v4 = vld [vmem:[%s1017_s2 + $0xe0] sm:$0xff]  ;;  %v83_v12 = vld [vmem:[%s1017_s2 + $0xe8] sm:$0xff] }
   0x3   :  { %v130_v5 = vld [vmem:[%s1017_s2 + $0x260] sm:$0xff]  ;;  %193 = vmatpush.msra.mxu2 %v132_v3  ;;  %v80_v6 = vld [vmem:[%s1017_s2 + $0xd0] sm:$0xff]  ;;  %205 = vmatpush.msra.mxu3 %v85_v9  ;;  %v81_v16 = vld [vmem:[%s1017_s2 + $0xd8] sm:$0xff] }
   0x4   :  { %146 = vmatpush.msra.mxu0 %v82_v4  ;;  %v128_v7 = vld [vmem:[%s1017_s2 + $0x250] sm:$0xff]  ;;  %v78_v10 = vld [vmem:[%s1017_s2 + $0xc0] sm:$0xff]  ;;  %v79_v20 = vld [vmem:[%s1017_s2 + $0xc8] sm:$0xff] }
   0x5   :  { %v116_v8 = vld [vmem:[%s1017_s2 + $0x1f0] sm:$0xff]  ;;  %194 = vmatpush.msra.mxu2 %v130_v5  ;;  %v114_v11 = vld [vmem:[%s1017_s2 + $0x1e0] sm:$0xff]  ;;  %206 = vmatpush.msra.mxu3 %v83_v12  ;;  %v77_v24 = vld [vmem:[%s1017_s2 + $0xb8] sm:$0xff] }
   0x6   :  { %165 = vmatpush.msra.mxu1 %v116_v8  ;;  %147 = vmatpush.msra.mxu0 %v80_v6  ;;  %v126_v13 = vld [vmem:[%s1017_s2 + $0x240] sm:$0xff]  ;;  %v112_v14 = vld [vmem:[%s1017_s2 + $0x1d0] sm:$0xff]  ;;  %v75_v28 = vld [vmem:[%s1017_s2 + $0xa8] sm:$0xff] }
   0x7   :  { %195 = vmatpush.msra.mxu2 %v128_v7  ;;  %v76_v15 = vld [vmem:[%s1017_s2 + $0xb0] sm:$0xff]  ;;  %v110_v18 = vld [vmem:[%s1017_s2 + $0x1c0] sm:$0xff]  ;;  %207 = vmatpush.msra.mxu3 %v81_v16  ;;  %v117_v31 = vld [vmem:[%s1017_s2 + $0x1f8] sm:$0xff] }
   0x8   :  { %166 = vmatpush.msra.mxu1 %v114_v11  ;;  %148 = vmatpush.msra.mxu0 %v78_v10  ;;  %v124_v17 = vld [vmem:[%s1017_s2 + $0x230] sm:$0xff]  ;;  %v74_v19 = vld [vmem:[%s1017_s2 + $0xa0] sm:$0xff]  ;;  %v73_v33 = vld [vmem:[%s1017_s2 + $0x98] sm:$0xff] }
   0x9   :  { %196 = vmatpush.msra.mxu2 %v126_v13  ;;  %v122_v21 = vld [vmem:[%s1017_s2 + $0x220] sm:$0xff]  ;;  %v108_v22 = vld [vmem:[%s1017_s2 + $0x1b0] sm:$0xff]  ;;  %208 = vmatpush.msra.mxu3 %v79_v20  ;;  %v115_v35 = vld [vmem:[%s1017_s2 + $0x1e8] sm:$0xff] }
   0xa   :  { %167 = vmatpush.msra.mxu1 %v112_v14  ;;  %149 = vmatpush.msra.mxu0 %v76_v15  ;;  %v72_v23 = vld [vmem:[%s1017_s2 + $0x90] sm:$0xff]  ;;  %v106_v26 = vld [vmem:[%s1017_s2 + $0x1a0] sm:$0xff]  ;;  %v71_v37 = vld [vmem:[%s1017_s2 + $0x88] sm:$0xff] }
   0xb   :  { %197 = vmatpush.msra.mxu2 %v124_v17  ;;  %v120_v25 = vld [vmem:[%s1017_s2 + $0x210] sm:$0xff]  ;;  %v70_v27 = vld [vmem:[%s1017_s2 + $0x80] sm:$0xff]  ;;  %209 = vmatpush.msra.mxu3 %v77_v24  ;;  %v113_v39 = vld [vmem:[%s1017_s2 + $0x1d8] sm:$0xff] }
   0xc   :  { %168 = vmatpush.msra.mxu1 %v110_v18  ;;  %150 = vmatpush.msra.mxu0 %v74_v19  ;;  %v118_v29 = vld [vmem:[%s1017_s2 + $0x200] sm:$0xff]  ;;  %v104_v30 = vld [vmem:[%s1017_s2 + $0x190] sm:$0xff]  ;;  %v69_v41 = vld [vmem:[%s1017_s2 + $0x78] sm:$0xff] }
   0xd   :  { %198 = vmatpush.msra.mxu2 %v122_v21  ;;  %v68_v32 = vld [vmem:[%s1017_s2 + $0x70] sm:$0xff]  ;;  %210 = vmatpush.msra.mxu3 %v75_v28  ;;  %v102_v34 = vld [vmem:[%s1017_s2 + $0x180] sm:$0xff]  ;;  %v111_v43 = vld [vmem:[%s1017_s2 + $0x1c8] sm:$0xff] }
   0xe   :  { %169 = vmatpush.msra.mxu1 %v108_v22  ;;  %151 = vmatpush.msra.mxu0 %v72_v23  ;;  %v66_v36 = vld [vmem:[%s1017_s2 + $0x60] sm:$0xff]  ;;  %v100_v38 = vld [vmem:[%s1017_s2 + $0x170] sm:$0xff]  ;;  %v67_v45 = vld [vmem:[%s1017_s2 + $0x68] sm:$0xff] }
   0xf   :  { %199 = vmatpush.msra.mxu2 %v120_v25  ;;  %211 = vmatpush.msra.mxu3 %v73_v33  ;;  %v64_v40 = vld [vmem:[%s1017_s2 + $0x50] sm:$0xff]  ;;  %v98_v42 = vld [vmem:[%s1017_s2 + $0x160] sm:$0xff]  ;;  %v109_v47 = vld [vmem:[%s1017_s2 + $0x1b8] sm:$0xff] }
  0x10   :  { %170 = vmatpush.msra.mxu1 %v106_v26  ;;  %152 = vmatpush.msra.mxu0 %v70_v27  ;;  %v62_v44 = vld [vmem:[%s1017_s2 + $0x40] sm:$0xff]  ;;  %v96_v46 = vld [vmem:[%s1017_s2 + $0x150] sm:$0xff]  ;;  %v65_v49 = vld [vmem:[%s1017_s2 + $0x58] sm:$0xff] }
  0x11   :  { %200 = vmatpush.msra.mxu2 %v118_v29  ;;  %212 = vmatpush.msra.mxu3 %v71_v37  ;;  %v60_v48 = vld [vmem:[%s1017_s2 + $0x30] sm:$0xff]  ;;  %v94_v50 = vld [vmem:[%s1017_s2 + $0x140] sm:$0xff]  ;;  %v107_v51 = vld [vmem:[%s1017_s2 + $0x1a8] sm:$0xff] }
  0x12   :  { %171 = vmatpush.msra.mxu1 %v104_v30  ;;  %153 = vmatpush.msra.mxu0 %v68_v32  ;;  %v58_v52 = vld [vmem:[%s1017_s2 + $0x20] sm:$0xff]  ;;  %v63_v53 = vld [vmem:[%s1017_s2 + $0x48] sm:$0xff]  ;;  %v92_v54 = vld [vmem:[%s1017_s2 + $0x130] sm:$0xff] }
  0x13   :  { %225 = vmatpush.msrb.mxu2 %v117_v31  ;;  %213 = vmatpush.msra.mxu3 %v69_v41  ;;  %v105_v55 = vld [vmem:[%s1017_s2 + $0x198] sm:$0xff]  ;;  %v56_v56 = vld [vmem:[%s1017_s2 + $0x10] sm:$0xff]  ;;  %v103_v58 = vld [vmem:[%s1017_s2 + $0x188] sm:$0xff] }
  0x14   :  { %172 = vmatpush.msra.mxu1 %v102_v34  ;;  %154 = vmatpush.msra.mxu0 %v66_v36  ;;  %v61_v57 = vld [vmem:[%s1017_s2 + $0x38] sm:$0xff]  ;;  %v54_v59 = vld [vmem:[%s1017_s2] sm:$0xff]  ;;  %v59_v63 = vld [vmem:[%s1017_s2 + $0x28] sm:$0xff] }
  0x15   :  { %226 = vmatpush.msrb.mxu2 %v115_v35  ;;  %214 = vmatpush.msra.mxu3 %v67_v45  ;;  %v133_v60 = vld [vmem:[%s1017_s2 + $0x278] sm:$0xff]  ;;  %v90_v62 = vld [vmem:[%s1017_s2 + $0x120] sm:$0xff]  ;;  %v99_v0 = vld [vmem:[%s1017_s2 + $0x168] sm:$0xff] }
  0x16   :  { %173 = vmatpush.msra.mxu1 %v100_v38  ;;  %155 = vmatpush.msra.mxu0 %v64_v40  ;;  %v101_v61 = vld [vmem:[%s1017_s2 + $0x178] sm:$0xff]  ;;  %v131_v1 = vld [vmem:[%s1017_s2 + $0x268] sm:$0xff]  ;;  %v88_v2 = vld [vmem:[%s1017_s2 + $0x110] sm:$0xff] }
  0x17   :  { %227 = vmatpush.msrb.mxu2 %v113_v39  ;;  %215 = vmatpush.msra.mxu3 %v65_v49  ;;  %v57_v3 = vld [vmem:[%s1017_s2 + $0x18] sm:$0xff]  ;;  %v86_v6 = vld [vmem:[%s1017_s2 + $0x100] sm:$0xff]  ;;  %v55_v7 = vld [vmem:[%s1017_s2 + $0x8] sm:$0xff] }
  0x18   :  { %174 = vmatpush.msra.mxu1 %v98_v42  ;;  %156 = vmatpush.msra.mxu0 %v62_v44  ;;  %v97_v4 = vld [vmem:[%s1017_s2 + $0x158] sm:$0xff]  ;;  %v95_v8 = vld [vmem:[%s1017_s2 + $0x148] sm:$0xff]  ;;  %v297_v18 = vld [vmem:[%s1018_s3 + $0xf0] sm:$0xff] }
  0x19   :  { %228 = vmatpush.msrb.mxu2 %v111_v43  ;;  %216 = vmatpush.msra.mxu3 %v63_v53  ;;  %v129_v5 = vld [vmem:[%s1017_s2 + $0x258] sm:$0xff]  ;;  %v127_v9 = vld [vmem:[%s1017_s2 + $0x248] sm:$0xff]  ;;  %v295_v19 = vld [vmem:[%s1018_s3 + $0xe0] sm:$0xff] }
  0x1a   :  { %175 = vmatpush.msra.mxu1 %v96_v46  ;;  %157 = vmatpush.msra.mxu0 %v60_v48  ;;  %v93_v10 = vld [vmem:[%s1017_s2 + $0x138] sm:$0xff]  ;;  %v91_v12 = vld [vmem:[%s1017_s2 + $0x128] sm:$0xff]  ;;  %v293_v20 = vld [vmem:[%s1018_s3 + $0xd0] sm:$0xff] }
  0x1b   :  { %229 = vmatpush.msrb.mxu2 %v109_v47  ;;  %217 = vmatpush.msra.mxu3 %v61_v57  ;;  %v125_v11 = vld [vmem:[%s1017_s2 + $0x238] sm:$0xff]  ;;  %v123_v13 = vld [vmem:[%s1017_s2 + $0x228] sm:$0xff]  ;;  %v305_v21 = vld [vmem:[%s1018_s3 + $0x130] sm:$0xff] }
  0x1c   :  { %176 = vmatpush.msra.mxu1 %v94_v50  ;;  %158 = vmatpush.msra.mxu0 %v58_v52  ;;  %v89_v14 = vld [vmem:[%s1017_s2 + $0x118] sm:$0xff]  ;;  %v87_v16 = vld [vmem:[%s1017_s2 + $0x108] sm:$0xff]  ;;  %v303_v22 = vld [vmem:[%s1018_s3 + $0x120] sm:$0xff] }
  0x1d   :  { %230 = vmatpush.msrb.mxu2 %v107_v51  ;;  %218 = vmatpush.msra.mxu3 %v59_v63  ;;  %v121_v15 = vld [vmem:[%s1017_s2 + $0x218] sm:$0xff]  ;;  %v119_v17 = vld [vmem:[%s1017_s2 + $0x208] sm:$0xff]  ;;  %v291_v23 = vld [vmem:[%s1018_s3 + $0xc0] sm:$0xff] }
  0x1e   :  { %177 = vmatpush.msra.mxu1 %v92_v54  ;;  %159 = vmatpush.msra.mxu0 %v56_v56  ;;  %v301_v24 = vld [vmem:[%s1018_s3 + $0x110] sm:$0xff]  ;;  %v299_v26 = vld [vmem:[%s1018_s3 + $0x100] sm:$0xff]  ;;  %v298_v50 = vld [vmem:[%s1018_s3 + $0xf8] sm:$0xff] }
  0x1f   :  { %231 = vmatpush.msrb.mxu2 %v105_v55  ;;  %219 = vmatpush.msra.mxu3 %v57_v3  ;;  %v289_v25 = vld [vmem:[%s1018_s3 + $0xb0] sm:$0xff]  ;;  %v287_v27 = vld [vmem:[%s1018_s3 + $0xa0] sm:$0xff]  ;;  %v296_v52 = vld [vmem:[%s1018_s3 + $0xe8] sm:$0xff] }
  0x20   :  { %160 = vmatpush.msra.mxu0 %v54_v59  ;;  %178 = vmatpush.msra.mxu1 %v90_v62  ;;  %v23_v28 = vld [vmem:[%s1019_s1] ss:$2 sm:$0x7]  ;;  %v285_v29 = vld [vmem:[%s1018_s3 + $0x90] sm:$0xff]  ;;  %v294_v54 = vld [vmem:[%s1018_s3 + $0xd8] sm:$0xff] }
  0x21   :  { %232 = vmatpush.msrb.mxu2 %v103_v58  ;;  %220 = vmatpush.msra.mxu3 %v55_v7  ;;  %v513_v30 = vld [vmem:[%s1019_s1 + $0x1] ss:$2 sm:$0x7]  ;;  %v30_v32 = vperm.slane %v23_v28, 0  ;;  %v31_v33 = vperm.slane %v23_v28, 1  ;;  %v32_v34 = vperm.slane %v23_v28, 2 }
  0x22   :  { %253 = vmatpush.msrb.mxu0 %v133_v60  ;;  %179 = vmatpush.msra.mxu1 %v88_v2  ;;  %v283_v31 = vld [vmem:[%s1018_s3 + $0x80] sm:$0xff]  ;;  %v281_v35 = vld [vmem:[%s1018_s3 + $0x70] sm:$0xff]  ;;  %v42_v36 = vperm.slane %v513_v30, 0  ;;  %v43_v37 = vperm.slane %v513_v30, 1  ;;  %v44_v38 = vperm.slane %v513_v30, 2  ;;  %v292_v56 = vld [vmem:[%s1018_s3 + $0xc8] sm:$0xff] }
  0x23   :  { %233 = vmatpush.msrb.mxu2 %v101_v61  ;;  %350 = vmatpush.msrb.mxu3 %v305_v21  ;;  %v279_v40 = vld [vmem:[%s1018_s3 + $0x60] sm:$0xff]  ;;  %v277_v51 = vld [vmem:[%s1018_s3 + $0x50] sm:$0xff]  ;;  %v290_v58 = vld [vmem:[%s1018_s3 + $0xb8] sm:$0xff] }
  0x24   :  { %254 = vmatpush.msrb.mxu0 %v131_v1  ;;  %180 = vmatpush.msra.mxu1 %v86_v6  ;;  %v275_v53 = vld [vmem:[%s1018_s3 + $0x40] sm:$0xff]  ;;  %v273_v55 = vld [vmem:[%s1018_s3 + $0x30] sm:$0xff]  ;;  %v288_v60 = vld [vmem:[%s1018_s3 + $0xa8] sm:$0xff] }
  0x25   :  { %234 = vmatpush.msrb.mxu2 %v99_v0  ;;  %351 = vmatpush.msrb.mxu3 %v303_v22  ;;  %v271_v57 = vld [vmem:[%s1018_s3 + $0x20] sm:$0xff]  ;;  %v269_v59 = vld [vmem:[%s1018_s3 + $0x10] sm:$0xff]  ;;  %v286_v62 = vld [vmem:[%s1018_s3 + $0x98] sm:$0xff] }
  0x26   :  { %255 = vmatpush.msrb.mxu0 %v129_v5  ;;  %318 = vmatpush.msrb.mxu1 %v297_v18  ;;  %v267_v61 = vld [vmem:[%s1018_s3] sm:$0xff]  ;;  %v284_v63 = vld [vmem:[%s1018_s3 + $0x88] sm:$0xff]  ;;  %v282_v0 = vld [vmem:[%s1018_s3 + $0x78] sm:$0xff] }
  0x27   :  { %235 = vmatpush.msrb.mxu2 %v97_v4  ;;  %352 = vmatpush.msrb.mxu3 %v301_v24  ;;  %v306_v1 = vld [vmem:[%s1018_s3 + $0x138] sm:$0xff]  ;;  %v280_v2 = vld [vmem:[%s1018_s3 + $0x68] sm:$0xff] }
  0x28   :  { %256 = vmatpush.msrb.mxu0 %v127_v9  ;;  %319 = vmatpush.msrb.mxu1 %v295_v19  ;;  %v304_v3 = vld [vmem:[%s1018_s3 + $0x128] sm:$0xff]  ;;  %v278_v4 = vld [vmem:[%s1018_s3 + $0x58] sm:$0xff]  ;;  %v412_v19 = vld [vmem:[%s1020_s4 + $0x60] sm:$0xff] }
  0x29   :  { %236 = vmatpush.msrb.mxu2 %v95_v8  ;;  %353 = vmatpush.msrb.mxu3 %v299_v26  ;;  %v302_v5 = vld [vmem:[%s1018_s3 + $0x118] sm:$0xff]  ;;  %v276_v6 = vld [vmem:[%s1018_s3 + $0x48] sm:$0xff] }
  0x2a   :  { %257 = vmatpush.msrb.mxu0 %v125_v11  ;;  %320 = vmatpush.msrb.mxu1 %v293_v20  ;;  %v300_v7 = vld [vmem:[%s1018_s3 + $0x108] sm:$0xff]  ;;  %v274_v8 = vld [vmem:[%s1018_s3 + $0x38] sm:$0xff] }
  0x2b   :  { %237 = vmatpush.msrb.mxu2 %v93_v10  ;;  %v272_v9 = vld [vmem:[%s1018_s3 + $0x28] sm:$0xff]  ;;  %v270_v10 = vld [vmem:[%s1018_s3 + $0x18] sm:$0xff] }
  0x2c   :  { %258 = vmatpush.msrb.mxu0 %v123_v13  ;;  %321 = vmatpush.msrb.mxu1 %v291_v23  ;;  %v268_v11 = vld [vmem:[%s1018_s3 + $0x8] sm:$0xff]  ;;  %v411_v20 = vld [vmem:[%s1020_s4 + $0x58] sm:$0xff] }
  0x2d   :  { %238 = vmatpush.msrb.mxu2 %v91_v12  ;;  %v514_v12 = vld [vmem:[%s1017_s2 + $0x280] ss:$8 sm:$0x3] }
  0x2e   :  { %259 = vmatpush.msrb.mxu0 %v121_v15  ;;  %322 = vmatpush.msrb.mxu1 %v289_v25  ;;  %v137_v13 = vperm.slane %v514_v12, 0  ;;  %v414_v15 = vld [vmem:[%s1020_s4 + $0x70] sm:$0xff]  ;;  %v138_v26 = vperm.slane %v514_v12, 1 }
  0x2f   :  { %239 = vmatpush.msrb.mxu2 %v89_v14  ;;  %v415_v14 = vld [vmem:[%s1020_s4 + $0x78] sm:$0xff] }
  0x30   :  { %260 = vmatpush.msrb.mxu0 %v119_v17  ;;  %323 = vmatpush.msrb.mxu1 %v287_v27  ;;  %v413_v17 = vld [vmem:[%s1020_s4 + $0x68] sm:$0xff] }
  0x31   :  { %240 = vmatpush.msrb.mxu2 %v87_v16 }
  0x32   :  { %324 = vmatpush.msrb.mxu1 %v285_v29 }
  0x34   :  { %325 = vmatpush.msrb.mxu1 %v283_v31 }
  0x36   :  { %326 = vmatpush.msrb.mxu1 %v281_v35  ;;  %v409_v35 = vld [vmem:[%s1020_s4 + $0x48] sm:$0xff] }
  0x38   :  { %327 = vmatpush.msrb.mxu1 %v279_v40  ;;  %v404_v40 = vld [vmem:[%s1020_s4 + $0x20] sm:$0xff] }
  0x3a   :  { %328 = vmatpush.msrb.mxu1 %v277_v51 }
  0x3c   :  { %329 = vmatpush.msrb.mxu1 %v275_v53 }
  0x3e   :  { %330 = vmatpush.msrb.mxu1 %v273_v55 }
  0x40   :  { %331 = vmatpush.msrb.mxu1 %v271_v57 }
  0x42   :  { %332 = vmatpush.msrb.mxu1 %v269_v59 }
  0x44   :  { %333 = vmatpush.msrb.mxu1 %v267_v61 }
  0x74   :  { %v27_v39 = vpop.permute.xlu0 %26 }
  0x75   :  { %v36_v41 = vmul.f32 %v30_v32, %v27_v39  ;;  %v37_v42 = vmul.f32 %v31_v33, %v27_v39  ;;  %v38_v43 = vmul.f32 %v32_v34, %v27_v39  ;;  %v410_v34 = vld [vmem:[%s1020_s4 + $0x50] sm:$0xff]  ;;  %v405_v39 = vld [vmem:[%s1020_s4 + $0x28] sm:$0xff] }
  0x77   :  { %v48_v44 = vadd.f32 %v42_v36, %v36_v41  ;;  %v49_v45 = vadd.f32 %v43_v37, %v37_v42  ;;  %v50_v46 = vadd.f32 %v44_v38, %v38_v43  ;;  %v408_v36 = vld [vmem:[%s1020_s4 + $0x40] sm:$0xff]  ;;  %v407_v37 = vld [vmem:[%s1020_s4 + $0x38] sm:$0xff]  ;;  %v406_v38 = vld [vmem:[%s1020_s4 + $0x30] sm:$0xff] }
  0x78   :  { %v403_v41 = vld [vmem:[%s1020_s4 + $0x18] sm:$0xff]  ;;  %v402_v42 = vld [vmem:[%s1020_s4 + $0x10] sm:$0xff]  ;;  %v401_v43 = vld [vmem:[%s1020_s4 + $0x8] sm:$0xff] }
  0x79   :  { %v51_v47 = vmax.f32 %v48_v44, 0.0  ;;  %v52_v48 = vmax.f32 %v49_v45, 0.0  ;;  %v53_v49 = vmax.f32 %v50_v46, 0.0  ;;  %v400_v44 = vld [vmem:[%s1020_s4] sm:$0xff]  ;;  %v419_v45 = vld [vmem:[%s1020_s4 + $0x98] sm:$0xff]  ;;  %v418_v46 = vld [vmem:[%s1020_s4 + $0x90] sm:$0xff] }
  0x7b   :  { %161 = vmatmul.f32.vlgmr.msra.gmra.mxu0 %v51_v47  ;;  %181 = vmatmul.f32.vlgmr.msra.gmra.mxu1 %v52_v48 }
  0x7c   :  { %515 = vmatmul.msk.f32.vlgmr.msra.gmra.mxu2 %vm141_vm0, %v53_v49  ;;  %221 = vmatmul.f32.vlgmr.msra.gmra.mxu3 %v51_v47  ;;  %v417_v47 = vld [vmem:[%s1020_s4 + $0x88] sm:$0xff] }
  0x7d   :  { %358 = vmatpush.msra.mxu3 %v298_v50  ;;  %390 = vmatpush.msra.mxu0 %v306_v1 }
  0x7e   :  { %425 = vmatpush.msra.mxu2 %v415_v14 }
  0x7f   :  { %359 = vmatpush.msra.mxu3 %v296_v52  ;;  %391 = vmatpush.msra.mxu0 %v304_v3 }
  0x80   :  { %426 = vmatpush.msra.mxu2 %v414_v15 }
  0x81   :  { %360 = vmatpush.msra.mxu3 %v294_v54  ;;  %392 = vmatpush.msra.mxu0 %v302_v5 }
  0x82   :  { %427 = vmatpush.msra.mxu2 %v413_v17 }
  0x83   :  { %516 = vmatmul.msk.f32.vlgmr.msrb.gmra.mxu0 %vm141_vm0, %v53_v49  ;;  %361 = vmatpush.msra.mxu3 %v292_v56  ;;  %v517_v49 = vld [vmem:[%s1018_s3 + $0x140] ss:$8 sm:$0x3] }
  0x84   :  { %241 = vmatmul.f32.vlgmr.msrb.gmra.mxu2 %v52_v48  ;;  %393 = vmatpush.msra.mxu0 %v300_v7  ;;  %v416_v48 = vld [vmem:[%s1020_s4 + $0x80] sm:$0xff]  ;;  %v310_v50 = vperm.slane %v517_v49, 0  ;;  %v311_v56 = vperm.slane %v517_v49, 1 }
  0x85   :  { %362 = vmatpush.msra.mxu3 %v290_v58  ;;  %428 = vmatpush.msra.mxu2 %v412_v19 }
  0x86   :  { %457 = vmatpush.msrb.mxu0 %v419_v45 }
  0x87   :  { %363 = vmatpush.msra.mxu3 %v288_v60  ;;  %429 = vmatpush.msra.mxu2 %v411_v20 }
  0x88   :  { %458 = vmatpush.msrb.mxu0 %v418_v46 }
  0x89   :  { %364 = vmatpush.msra.mxu3 %v286_v62  ;;  %430 = vmatpush.msra.mxu2 %v410_v34  ;;  %v525_v62 = vld [vmem:[%s1020_s4 + $0xa0] ss:$0 sm:$0xff] }
  0x8a   :  { %459 = vmatpush.msrb.mxu0 %v417_v47 }
  0x8b   :  { %365 = vmatpush.msra.mxu3 %v284_v63  ;;  %431 = vmatpush.msra.mxu2 %v409_v35 }
  0x8c   :  { %460 = vmatpush.msrb.mxu0 %v416_v48 }
  0x8d   :  { %366 = vmatpush.msra.mxu3 %v282_v0  ;;  %432 = vmatpush.msra.mxu2 %v408_v36 }
  0x8f   :  { %367 = vmatpush.msra.mxu3 %v280_v2  ;;  %433 = vmatpush.msra.mxu2 %v407_v37 }
  0x91   :  { %368 = vmatpush.msra.mxu3 %v278_v4  ;;  %434 = vmatpush.msra.mxu2 %v406_v38 }
  0x93   :  { %369 = vmatpush.msra.mxu3 %v276_v6  ;;  %435 = vmatpush.msra.mxu2 %v405_v39 }
  0x95   :  { %370 = vmatpush.msra.mxu3 %v274_v8  ;;  %436 = vmatpush.msra.mxu2 %v404_v40 }
  0x97   :  { %371 = vmatpush.msra.mxu3 %v272_v9  ;;  %437 = vmatpush.msra.mxu2 %v403_v41 }
  0x99   :  { %372 = vmatpush.msra.mxu3 %v270_v10  ;;  %438 = vmatpush.msra.mxu2 %v402_v42 }
  0x9b   :  { %373 = vmatpush.msra.mxu3 %v268_v11  ;;  %439 = vmatpush.msra.mxu2 %v401_v43 }
  0x9d   :  { %440 = vmatpush.msra.mxu2 %v400_v44 }
  0xf8   :  { %v162_v16 = vpop.f32.mrf.mxu0  ;;  %v182_v21 = vpop.f32.mrf.mxu1 }
  0xf9   :  { %v163_v18 = vadd.f32 %v162_v16, %v137_v13 }
  0xfb   :  { %v183_v22 = vadd.f32 %v182_v21, %v163_v18 }
  0xff   :  { %v202_v23 = vpop.f32.mrf.mxu2  ;;  %v222_v27 = vpop.f32.mrf.mxu3 }
 0x100   :  { %v203_v24 = vadd.f32 %v202_v23, %v183_v22  ;;  %v223_v28 = vadd.f32 %v222_v27, %v138_v26  ;;  %v262_v31 = vpop.f32.mrf.mxu0 }
 0x102   :  { %v265_v25 = vmax.f32 %v203_v24, 0.0 }
 0x104   :  { %334 = vmatmul.f32.vlgmr.msrb.gmra.mxu1 %v265_v25 }
 0x107   :  { %v242_v29 = vpop.f32.mrf.mxu2 }
 0x108   :  { %v243_v30 = vadd.f32 %v242_v29, %v223_v28 }
 0x10a   :  { %v263_v32 = vadd.f32 %v262_v31, %v243_v30 }
 0x10c   :  { %v266_v33 = vmax.f32 %v263_v32, 0.0 }
 0x10e   :  { %518 = vmatmul.msk.f32.vlgmr.msrb.gmra.mxu3 %vm314_vm1, %v266_v33  ;;  %519 = vmatmul.msk.f32.vlgmr.msra.gmra.mxu0 %vm314_vm1, %v266_v33 }
 0x116   :  { %374 = vmatmul.f32.vlgmr.msra.gmra.mxu3 %v265_v25 }
 0x181   :  { %v335_v51 = vpop.f32.mrf.mxu1 }
 0x182   :  { %v336_v52 = vadd.f32 %v335_v51, %v310_v50 }
 0x18b   :  { %v395_v59 = vpop.f32.mrf.mxu0 }
 0x191   :  { %v355_v53 = vpop.f32.mrf.mxu3 }
 0x192   :  { %v356_v54 = vadd.f32 %v355_v53, %v336_v52 }
 0x194   :  { %v398_v55 = vmax.f32 %v356_v54, 0.0 }
 0x196   :  { %441 = vmatmul.f32.vlgmr.msra.gmra.mxu2 %v398_v55 }
 0x199   :  { %v375_v57 = vpop.f32.mrf.mxu3 }
 0x19a   :  { %v376_v58 = vadd.f32 %v375_v57, %v311_v56 }
 0x19c   :  { %v396_v60 = vadd.f32 %v395_v59, %v376_v58 }
 0x19e   :  { %v399_v61 = vmax.f32 %v396_v60, 0.0 }
 0x1a0   :  { %520 = vmatmul.msk.f32.vlgmr.msrb.gmra.mxu0 %vm314_vm1, %v399_v61 }
 0x219   :  { %v442_v63 = vpop.f32.mrf.mxu2 }
 0x21a   :  { %v443_v0 = vadd.f32 %v525_v62, %v442_v63 }
 0x21d   :  { %v462_v1 = vpop.f32.mrf.mxu0 }
 0x21e   :  { %v463_v2 = vadd.f32 %v462_v1, %v443_v0 }
 0x220   :  { %v467_v3 = vmul.f32 %v463_v2, %v463_v2  ;;  %474 = vst.msk [vmem:[%s1021_s5] sm:$0xff] %vm473_vm2, %v463_v2  ;;  %v465_v4 = vmul.f32 1.442695, %v463_v2  ;;  %v475_v8 = vsel %vm473_vm2, %v463_v2, 0.0 }
 0x222   :  { %469 = vrot.lane.b32.xlu0 %v467_v3, %s529_s8  ;;  %526 = vpow2.f32 %v465_v4 }
 0x228   :  { %v527_v5 = vpop.eup %526 }
 0x294   :  { %v470_v6 = vpop.permute.xlu0 %469 }
 0x295   :  { %v472_v7 = vadd.f32 %v527_v5, %v470_v6 }
 0x297   :  { %486 = vrot.lane.b32.xlu1 %v472_v7, %s530_s9 }
 0x2c1   :  { %476 = vadd.xlane.f32.xlu1 %v475_v8 }
 0x309   :  { %v487_v9 = vpop.permute.xlu1 %486 }
 0x30a   :  { %v489_v10 = vsel %vm473_vm2, %v487_v9, 0.0 }
 0x30b   :  { %490 = vadd.xlane.f32.xlu2 %v489_v10 }
 0x334   :  { %v477_v11 = vpop.xlane.xlu1 %476 }
 0x335   :  { %v478_v12 = vrot.slane %v477_v11, 4 }
 0x337   :  { %v479_v13 = vadd.f32 %v478_v12, %v477_v11 }
 0x339   :  { %v480_v14 = vrot.slane %v479_v13, 2 }
 0x33b   :  { %v481_v15 = vadd.f32 %v480_v14, %v479_v13 }
 0x33d   :  { %v482_v17 = vrot.slane %v481_v15, 1 }
 0x33f   :  { %v483_v20 = vadd.f32 %v482_v17, %v481_v15 }
 0x341   :  { %v484_v23 = vmul.f32 0.025, %v483_v20 }
 0x343   :  { %v499_v26 = vmul.f32 %v484_v23, %v484_v23 }
 0x37e   :  { %v491_v16 = vpop.xlane.xlu2 %490 }
 0x37f   :  { %v492_v18 = vrot.slane %v491_v16, 4 }
 0x381   :  { %v493_v19 = vadd.f32 %v492_v18, %v491_v16 }
 0x383   :  { %v494_v21 = vrot.slane %v493_v19, 2 }
 0x385   :  { %v495_v22 = vadd.f32 %v494_v21, %v493_v19 }
 0x387   :  { %v496_v24 = vrot.slane %v495_v22, 1 }
 0x389   :  { %v497_v25 = vadd.f32 %v496_v24, %v495_v22 }
 0x38b   :  { %v498_v27 = vmul.f32 0.025, %v497_v25 }
 0x38d   :  { %v500_v28 = vsub.f32 %v498_v27, %v499_v26 }
 0x38f   :  { %v502_v29 = vsel %vm501_vm3, %v484_v23, %v500_v28 }
 0x390   :  { %504 = vst.msk [vmem:[%s1022_s6] sm:$0x1] %vm503_vm4, %v502_v29 }

</bundles_post_ra>
